<compile_context>
chip_gen: v6e
topology: v6e:2x2x1
jax: 0.10.0
libtpu: 0.0.40
codegen_flags: <defaults>
</compile_context>

<pallas_src>
import jax
import jax.numpy as jnp
from jax.experimental import pallas as pl
from jax.experimental.pallas import tpu as pltpu

_LANE = 128            # TPU lane width (last dim of a vreg)
_MAX_BLOCK_ROWS = 4096  # 4096*128*4B = 2 MiB per f32 block; ~8 MiB double-buffered


def _add_mul_kernel(x_ref, o_ref):
    # (x + 1) * 2  ==  x * 2 + 2, computed in the input dtype on the VPU.
    x = x_ref[...]
    two = jnp.asarray(2, dtype=x.dtype)
    o_ref[...] = x * two + two


def _round_up(v, m):
    return ((v + m - 1) // m) * m


def pt_module_forward_stacked(x):
    """x: stacked batch (B, ...). Returns (x + 1) * 2 with the same shape.

    This is the performance path: one pallas_call over a flattened,
    lane-dense 2-D view of the whole batch.
    """
    orig_shape = x.shape
    dtype = x.dtype
    total = x.size

    # Flatten to (rows, 128): last dim maps onto the 128-lane axis so all
    # stores are unmasked vst.
    m = _round_up(total, _LANE) // _LANE
    pad = m * _LANE - total
    flat = x.reshape(-1)
    if pad:
        flat = jnp.pad(flat, (0, pad))
    x2d = flat.reshape(m, _LANE)

    # Big blocks amortize per-step overhead; cap keeps double-buffered
    # input+output comfortably inside v7x's 32 MiB scoped VMEM default.
    if m <= _MAX_BLOCK_ROWS:
        block_rows = m                # block == full array: always legal
    else:
        block_rows = _MAX_BLOCK_ROWS  # multiple of 8 (sublane-aligned)

    grid = (pl.cdiv(m, block_rows),)

    out2d = pl.pallas_call(
        _add_mul_kernel,
        out_shape=jax.ShapeDtypeStruct((m, _LANE), dtype),
        grid=grid,
        in_specs=[pl.BlockSpec((block_rows, _LANE), lambda i: (i, 0))],
        out_specs=pl.BlockSpec((block_rows, _LANE), lambda i: (i, 0)),
        compiler_params=pltpu.CompilerParams(
            dimension_semantics=("parallel",),   # shards grid across v7x's 2 TCs
            vmem_limit_bytes=32 * 1024 * 1024,
        ),
    )(x2d)

    out = out2d.reshape(-1)
    if pad:
        out = out[:total]
    return out.reshape(orig_shape)


def pt_module_forward(x):
    """Matches PtModule.forward semantics: list of per-batch-element tensors.

    The kernel runs once on the stacked batch; the list is a cheap unstack
    of the single stacked result (kept outside any hot/timed path).
    """
    out = pt_module_forward_stacked(x)
    return [out[b] for b in range(out.shape[0])]


if __name__ == "__main__":
    key = jax.random.PRNGKey(0)
    # small deterministic input: batch of 4 tensors, each 16x128
    x = jax.random.normal(key, (4, 16, 128), dtype=jnp.float32)

    # performance path: stacked result
    stacked = jax.block_until_ready(pt_module_forward_stacked(x))
    ref = (x + 1.0) * 2.0
    assert jnp.allclose(stacked, ref, atol=1e-6), "stacked output mismatch"

    # PyTorch-contract path: list of per-element tensors
    outputs = pt_module_forward(x)
    outputs = [jax.block_until_ready(o) for o in outputs]
    for b, o in enumerate(outputs):
        assert jnp.allclose(o, ref[b], atol=1e-6), f"mismatch at element {b}"

    print("KERNEL_OK")
</pallas_src>

<mosaic_0001>
module attributes {stable_mosaic.version = 11 : i64} {
  func.func @_add_mul_kernel(%arg0: i32, %arg1: memref<64x128xf32, #tpu.memory_space<vmem>>, %arg2: memref<64x128xf32, #tpu.memory_space<vmem>>) attributes {dimension_semantics = [#tpu.dimension_semantics<parallel>], iteration_bounds = array<i64: 1>, scalar_prefetch = 0 : i64, scratch_operands = 0 : i64, tpu.core_type = #tpu.core_type<tc>, window_params = [{transform_indices = @transform_0, window_bounds = array<i64: 64, 128>}, {transform_indices = @transform_1, window_bounds = array<i64: 64, 128>}]} {
    %c0 = arith.constant 0 : index
    %c0_0 = arith.constant 0 : index
    %0 = vector.load %arg1[%c0, %c0_0] : memref<64x128xf32, #tpu.memory_space<vmem>>, vector<64x128xf32>
    %cst = arith.constant 2.000000e+00 : f32
    %1 = vector.broadcast %cst : f32 to vector<64x128xf32>
    %2 = arith.mulf %0, %1 : vector<64x128xf32>
    %cst_1 = arith.constant 2.000000e+00 : f32
    %3 = vector.broadcast %cst_1 : f32 to vector<64x128xf32>
    %4 = arith.addf %2, %3 : vector<64x128xf32>
    %c0_2 = arith.constant 0 : index
    %c0_3 = arith.constant 0 : index
    %5 = vector.load %arg2[%c0_2, %c0_3] : memref<64x128xf32, #tpu.memory_space<vmem>>, vector<64x128xf32>
    tpu.vector_store %arg2[%c0_2, %c0_3], %4 {strides = array<i32>} : memref<64x128xf32, #tpu.memory_space<vmem>>, vector<64x128xf32>,
    return
  }
  func.func @transform_0(%arg0: i32) -> (i32, i32) {
    %c0_i32 = arith.constant 0 : i32
    %c0_i32_0 = arith.constant 0 : i32
    return %arg0, %c0_i32 : i32, i32
  }
  func.func @transform_1(%arg0: i32) -> (i32, i32) {
    %c0_i32 = arith.constant 0 : i32
    %c0_i32_0 = arith.constant 0 : i32
    return %arg0, %c0_i32 : i32, i32
  }
}

</mosaic_0001>

<bundles_post_ra>
// kernel: tpu_custom_call.1
= control target key start
LH: loop header
LB: loop body
LE: loop exit
PB: predicated region body
PF: predicated region fallthrough
CT: control target
= control target key end

     0   :  { %6 = vsyncpa [#allocation3], 0  ;;  %s146_s0 = inlined_call_operand.hbm [shape: f32[64,128], index: 0, kind: input, shape index: {}]   ;;  %s147_s1 = inlined_call_operand.hbm [shape: f32[64,128], index: 1, kind: output, shape index: {}]  }
   0x1   :  { %7 = vsyncpa [#allocation4], 0  ;;  %s120_s6 = smov [#allocation2]  }
   0x2   :  { %s13_s7 = sshll.u32 %s120_s6, 4  ;;  %s14_s7 = int_to_ptr.vmem [resolvable:$true] %s13_s7 }
   0x3   :  { %s84_s8 = scalar_lea.vmem %s14_s7, 1024  ;;  %p89_p1 = scmp.lt.s32.totalorder %s14_s7, %s14_s7 }
   0x4   :  { %p85_p0 = scmp.ne.s32.totalorder %s14_s7, %s84_s8  ;;  %p90_p2 = scmp.lt.s32.totalorder %s84_s8, %s84_s8 }
   0x6   :  { %p91_p3 = por %p90_p2, %p89_p1 }
   0x8   :  { %p92_p4 = pnand %p91_p3, %p85_p0 }
   0xa   :  { %95 = shalt.err (!%p92_p4)
}
   0xb   :  { %s121_s9 = smov 128   ;;  %s122_s10 = smov 8  }
   0xc   :  { %19 = dma.hbm_to_vmem [thread:$0]  %s146_s0, 1024, %s14_s7, [#allocation3], %s121_s9, %s121_s9, %s122_s10  }
   0xd   :  { %116 = dma.done.wait [#allocation3], 1024  }
   0xe   :  { %117 = vsyncadd [#allocation3], 4294966272  ;;  %v23_v0 = vld [vmem:[#allocation2] sm:$0xff]  ;;  %v24_v1 = vld [vmem:[#allocation2 + $0x8] sm:$0xff]  ;;  %s123_s0 = smov [#allocation5]  }
   0xf   :  { %v25_v2 = vld [vmem:[#allocation2 + $0x10] sm:$0xff]  ;;  %v31_v3 = vmul.f32 2.0, %v23_v0  ;;  %v32_v4 = vmul.f32 2.0, %v24_v1  ;;  %v26_v6 = vld [vmem:[#allocation2 + $0x18] sm:$0xff]  ;;  %v27_v7 = vld [vmem:[#allocation2 + $0x20] sm:$0xff]  ;;  %s60_s13 = sshll.u32 %s123_s0, 4  ;;  %s61_s13 = int_to_ptr.vmem [resolvable:$true] %s60_s13 }
  0x10   :  { %v33_v5 = vmul.f32 2.0, %v25_v2  ;;  %v28_v8 = vld [vmem:[#allocation2 + $0x28] sm:$0xff]  ;;  %v34_v9 = vmul.f32 2.0, %v26_v6  ;;  %v35_v10 = vmul.f32 2.0, %v27_v7  ;;  %v29_v12 = vld [vmem:[#allocation2 + $0x30] sm:$0xff]  ;;  %v30_v13 = vld [vmem:[#allocation2 + $0x38] sm:$0xff]  ;;  %p101_p6 = scmp.lt.s32.totalorder %s61_s13, %s61_s13 }
  0x11   :  { %v36_v11 = vmul.f32 2.0, %v28_v8  ;;  %v39_v14 = vadd.f32 2.0, %v31_v3  ;;  %v40_v15 = vadd.f32 2.0, %v32_v4  ;;  %v37_v17 = vmul.f32 2.0, %v29_v12  ;;  %s96_s14 = scalar_lea.vmem %s61_s13, 1024 }
  0x12   :  { %v41_v16 = vadd.f32 2.0, %v33_v5  ;;  %v42_v18 = vadd.f32 2.0, %v34_v9  ;;  %v43_v19 = vadd.f32 2.0, %v35_v10  ;;  %v38_v21 = vmul.f32 2.0, %v30_v13  ;;  %p97_p5 = scmp.ne.s32.totalorder %s61_s13, %s96_s14  ;;  %p102_p7 = scmp.lt.s32.totalorder %s96_s14, %s96_s14 }
  0x13   :  { %v44_v20 = vadd.f32 2.0, %v36_v11  ;;  %47 = vst [vmem:[#allocation5] sm:$0xff] %v39_v14  ;;  %48 = vst [vmem:[#allocation5 + $0x8] sm:$0xff] %v40_v15  ;;  %v45_v22 = vadd.f32 2.0, %v37_v17 }
  0x14   :  { %49 = vst [vmem:[#allocation5 + $0x10] sm:$0xff] %v41_v16  ;;  %50 = vst [vmem:[#allocation5 + $0x18] sm:$0xff] %v42_v18  ;;  %v46_v23 = vadd.f32 2.0, %v38_v21  ;;  %p103_p8 = por %p102_p7, %p101_p6 }
  0x15   :  { %51 = vst [vmem:[#allocation5 + $0x20] sm:$0xff] %v43_v19  ;;  %52 = vst [vmem:[#allocation5 + $0x28] sm:$0xff] %v44_v20 }
  0x16   :  { %53 = vst [vmem:[#allocation5 + $0x30] sm:$0xff] %v45_v22  ;;  %54 = vst [vmem:[#allocation5 + $0x38] sm:$0xff] %v46_v23  ;;  %p104_p9 = pnand %p103_p8, %p97_p5 }
  0x18   :  { %107 = shalt.err (!%p104_p9)
}
  0x19   :  { %66 = dma.vmem_to_hbm [thread:$0]  %s61_s13, 1024, %s147_s1, [#allocation4], %s121_s9, %s121_s9, %s122_s10  }
  0x1a   :  { %118 = dma.done.wait [#allocation4], 1024  }
  0x1b   :  { %119 = vsyncadd [#allocation4], 4294966272 }
  0x1c   :  { %70 = vsyncpa [#allocation3], 1 }
  0x1d   :  { %71 = vsyncpa [#allocation4], 1 }

</bundles_post_ra>
